<compile_context>
chip_gen: v5e
topology: v5e:2x2
jax: 0.10.0
libtpu: 0.0.40
codegen_flags: <defaults>
</compile_context>

<pallas_src>
import numpy as np
import jax
import jax.numpy as jnp
from jax.experimental import pallas as pl
from jax.experimental.pallas import tpu as pltpu


# ----------------------------------------------------------------------------
# Parameter construction (glue, numpy float64 -- mirrors torch double precision)
# ----------------------------------------------------------------------------
def lattice_edges(image_height: int, image_width: int):
    """Directed edges of the 4-connected 2D lattice (same as the torch reference)."""
    mat_is, mat_js = np.meshgrid(range(image_height), range(image_width))
    centers = np.vstack((mat_is.flatten(), mat_js.flatten())).T
    adjacency = np.array(((0, -1), (0, +1), (-1, 0), (+1, 0)))
    neighbors = (centers[:, None, :] + adjacency).reshape(-1, 2)
    i_valid = (
        (neighbors[:, 0] >= 0) * (neighbors[:, 0] < image_height)
        * (neighbors[:, 1] >= 0) * (neighbors[:, 1] < image_width)
    )
    edges_center = centers.repeat(len(adjacency), axis=0)[i_valid].dot((image_width, 1))
    edges_neighbor = neighbors[i_valid].dot((image_width, 1))
    return edges_center, edges_neighbor


def build_params(in_planes: int, image_height: int, image_width: int,
                 out_planes: int, seed: int = 0):
    """Deterministic parameter init + folding of the linear solve into dense matrices.

    Returns:
      m_t:  [out_planes, in_planes*N, N] bfloat16 with
            m_t[o, c*N + k, n] = (w_{o,c} * (Z_{o,c}+1)^{-1})[n, k]
      bias: [out_planes] float32
    """
    rng = np.random.RandomState(seed)
    n = image_height * image_width
    ec, en = lattice_edges(image_height, image_width)

    weights = np.ones((out_planes, in_planes), dtype=np.float64)   # nn.Parameter(torch.ones(in_planes))
    bias = np.zeros((out_planes,), dtype=np.float32)               # nn.Parameter(torch.tensor(0.0))

    m = np.zeros((out_planes, in_planes * n, n), dtype=np.float32)
    for o in range(out_planes):
        for c in range(in_planes):
            # torch.rand(H, W, dtype=float64) analogue (uniform [0, 1), float64)
            log_r = rng.rand(image_height, image_width)
            cond = np.exp(log_r).ravel()
            off = np.zeros((n, n), dtype=np.float64)
            off[ec, en] = cond[ec] + cond[en]
            zmat = np.diag(off.sum(axis=1)) - off
            # TODO(synk): torch.linalg.solve (dense LU) has no Pallas primitive; the
            # parameter-only system matrix is inverted here (float64) and the solve is
            # applied in-kernel as a matmul against the precomputed inverse.
            ainv = np.linalg.inv(zmat + 1.0)
            m[o, c * n:(c + 1) * n, :] = (weights[o, c] * ainv).T.astype(np.float32)

    # bf16 storage: halves the dominant HBM stream; matmul accumulates in f32 on MXU.
    m_t = jnp.asarray(m).astype(jnp.bfloat16)
    return m_t, jnp.asarray(bias)


# ----------------------------------------------------------------------------
# Pallas kernel
# ----------------------------------------------------------------------------
def _poisson_kernel(x_ref, m_ref, b_ref, o_ref):
    # x_ref: (B, K) bf16   (K = C*N, already mean-centered in the wrapper)
    # m_ref: (1, K, tn) bf16
    # b_ref: (1, 1, tn) f32
    # o_ref: (1, B, tn) f32
    y = jnp.dot(x_ref[...], m_ref[0], preferred_element_type=jnp.float32)
    o_ref[0] = y + b_ref[0]


def multi_solve_poisson_tensor(x, m_t, bias):
    """x: [B, C, H, W] float32 -> [B, O, H, W] float32."""
    B, C, H, W = x.shape
    O, K, N = m_t.shape
    assert N == H * W and K == C * N, (m_t.shape, x.shape)

    # Hoisted centering: per-channel mean over batch + spatial (matches
    # input_currents - input_currents.mean() inside each SolvePoisson), done once in f32.
    xc = x - jnp.mean(x, axis=(0, 2, 3), keepdims=True)
    xc = xc.reshape(B, K).astype(jnp.bfloat16)           # (B, C*N) bf16 MXU operand

    # Lane-dense bias tiles (kept in f32 for the epilogue add).
    bias_b = jnp.broadcast_to(
        bias.astype(jnp.float32).reshape(O, 1, 1), (O, 1, N))

    # Column tiling of N gives >= O*2 disjoint parallel blocks (helps v7x's 2 TCs).
    tn = 128 if (N % 128 == 0 and N > 128) else N
    n_tiles = N // tn
    # VMEM per step: M tile = K*tn*2 bytes (256 KiB here), double-buffered; x resident
    # (constant index_map). For much larger C*N, tile K and add a reduction axis.

    out = pl.pallas_call(
        _poisson_kernel,
        out_shape=jax.ShapeDtypeStruct((O, B, N), jnp.float32),
        grid=(O, n_tiles),
        in_specs=[
            pl.BlockSpec((B, K), lambda o, j: (0, 0)),         # x: VMEM-resident
            pl.BlockSpec((1, K, tn), lambda o, j: (o, 0, j)),  # M: streamed column tile
            pl.BlockSpec((1, 1, tn), lambda o, j: (o, 0, j)),  # bias tile
        ],
        out_specs=pl.BlockSpec((1, B, tn), lambda o, j: (o, 0, j)),
        compiler_params=pltpu.CompilerParams(
            dimension_semantics=("parallel", "parallel"),
        ),
    )(xc, m_t, bias_b)

    return jnp.transpose(out, (1, 0, 2)).reshape(B, O, H, W)


# ----------------------------------------------------------------------------
# Pure numpy reference (same bf16-rounded folded matrices / inputs, f32 math)
# ----------------------------------------------------------------------------
def _reference(x, m_t, bias):
    x = np.asarray(x, dtype=np.float32)
    m = np.asarray(jnp.asarray(m_t, dtype=jnp.float32))                 # (O, C*N, N)
    b = np.asarray(jnp.asarray(bias, dtype=jnp.float32)).reshape(-1)    # (O,)
    B, C, H, W = x.shape
    O = m.shape[0]
    N = H * W
    xf = x.reshape(B, C, N)
    xc = xf - xf.mean(axis=(0, 2), keepdims=True)        # per-channel mean (batch+spatial)
    xc = np.asarray(jnp.asarray(xc).astype(jnp.bfloat16).astype(jnp.float32))
    xc = xc.reshape(B, C * N)
    out = np.einsum("bk,okn->bon", xc, m).astype(np.float32) + b[None, :, None]
    return out.reshape(B, O, H, W).astype(np.float32)


if __name__ == "__main__":
    B, C, H, W, O = 2, 4, 16, 16, 3

    m_t, bias = build_params(C, H, W, O, seed=0)

    key = jax.random.PRNGKey(0)
    x = jax.random.normal(key, (B, C, H, W), dtype=jnp.float32)

    y = multi_solve_poisson_tensor(x, m_t, bias)
    y = jax.block_until_ready(y)

    assert y.shape == (B, O, H, W), y.shape
    assert y.dtype == jnp.float32, y.dtype

    y_ref = _reference(x, m_t, bias)
    np.testing.assert_allclose(np.asarray(y), y_ref, rtol=1e-2, atol=2e-3)

    print("KERNEL_OK")
</pallas_src>

<mosaic_0001>
module attributes {stable_mosaic.version = 11 : i64} {
  func.func @_poisson_kernel(%arg0: i32, %arg1: i32, %arg2: memref<2x1024xbf16, #tpu.memory_space<vmem>>, %arg3: memref<1x1024x128xbf16, #tpu.memory_space<vmem>>, %arg4: memref<1x1x128xf32, #tpu.memory_space<vmem>>, %arg5: memref<1x2x128xf32, #tpu.memory_space<vmem>>) attributes {dimension_semantics = [#tpu.dimension_semantics<parallel>, #tpu.dimension_semantics<parallel>], iteration_bounds = array<i64: 3, 2>, scalar_prefetch = 0 : i64, scratch_operands = 0 : i64, tpu.core_type = #tpu.core_type<tc>, window_params = [{pipeline_mode = #tpu.pipeline_mode<synchronous>, transform_indices = @transform_0, window_bounds = array<i64: 2, 1024>}, {transform_indices = @transform_1, window_bounds = array<i64: 1, 1024, 128>}, {transform_indices = @transform_2, window_bounds = array<i64: 1, 1, 128>}, {transform_indices = @transform_3, window_bounds = array<i64: 1, 2, 128>}]} {
    %c0 = arith.constant 0 : index
    %c0_0 = arith.constant 0 : index
    %0 = vector.load %arg2[%c0, %c0_0] : memref<2x1024xbf16, #tpu.memory_space<vmem>>, vector<2x1024xbf16>
    %c0_1 = arith.constant 0 : index
    %c0_2 = arith.constant 0 : index
    %c0_3 = arith.constant 0 : index
    %1 = vector.load %arg3[%c0_1, %c0_2, %c0_3] : memref<1x1024x128xbf16, #tpu.memory_space<vmem>>, vector<1x1024x128xbf16>
    %2 = vector.shape_cast %1 : vector<1x1024x128xbf16> to vector<1024x128xbf16>
    %cst = arith.constant dense<0.000000e+00> : vector<2x128xf32>
    %3 = tpu.matmul %0, %2, %cst {dimension_numbers = #tpu.dot_dimension_numbers<[1], [0], [0], [1], [0, 0, 1, 1], [], []>} : vector<2x1024xbf16>, vector<1024x128xbf16>, vector<2x128xf32> -> vector<2x128xf32>
    %c0_4 = arith.constant 0 : index
    %c0_5 = arith.constant 0 : index
    %c0_6 = arith.constant 0 : index
    %4 = vector.load %arg4[%c0_4, %c0_5, %c0_6] : memref<1x1x128xf32, #tpu.memory_space<vmem>>, vector<1x1x128xf32>
    %5 = vector.shape_cast %4 : vector<1x1x128xf32> to vector<1x128xf32>
    %6 = vector.broadcast %5 : vector<1x128xf32> to vector<2x128xf32>
    %7 = arith.addf %3, %6 : vector<2x128xf32>
    %c0_7 = arith.constant 0 : index
    %c0_8 = arith.constant 0 : index
    %c0_9 = arith.constant 0 : index
    %8 = vector.load %arg5[%c0_7, %c0_8, %c0_9] : memref<1x2x128xf32, #tpu.memory_space<vmem>>, vector<1x2x128xf32>
    %9 = vector.shape_cast %8 : vector<1x2x128xf32> to vector<2x128xf32>
    %10 = vector.shape_cast %7 : vector<2x128xf32> to vector<1x2x128xf32>
    tpu.vector_store %arg5[%c0_7, %c0_8, %c0_9], %10 {strides = array<i32>} : memref<1x2x128xf32, #tpu.memory_space<vmem>>, vector<1x2x128xf32>,
    return
  }
  func.func @transform_0(%arg0: i32, %arg1: i32) -> (i32, i32) {
    %c0_i32 = arith.constant 0 : i32
    %c0_i32_0 = arith.constant 0 : i32
    %c0_i32_1 = arith.constant 0 : i32
    return %c0_i32, %c0_i32_0 : i32, i32
  }
  func.func @transform_1(%arg0: i32, %arg1: i32) -> (i32, i32, i32) {
    %c0_i32 = arith.constant 0 : i32
    %c0_i32_0 = arith.constant 0 : i32
    return %arg0, %c0_i32, %arg1 : i32, i32, i32
  }
  func.func @transform_2(%arg0: i32, %arg1: i32) -> (i32, i32, i32) {
    %c0_i32 = arith.constant 0 : i32
    %c0_i32_0 = arith.constant 0 : i32
    return %arg0, %c0_i32, %arg1 : i32, i32, i32
  }
  func.func @transform_3(%arg0: i32, %arg1: i32) -> (i32, i32, i32) {
    %c0_i32 = arith.constant 0 : i32
    %c0_i32_0 = arith.constant 0 : i32
    return %arg0, %c0_i32, %arg1 : i32, i32, i32
  }
}

</mosaic_0001>

<bundles_post_ra>
// kernel: tpu_custom_call.1
= control target key start
LH: loop header
LB: loop body
LE: loop exit
PB: predicated region body
PF: predicated region fallthrough
CT: control target
= control target key end

     0   :  { %s1951_s0 = inlined_call_operand.hbm [shape: bf16[2,1024], index: 0, kind: input, shape index: {}]   ;;  %s1952_s1 = inlined_call_operand.hbm [shape: bf16[3,1024,256], index: 1, kind: input, shape index: {}]   ;;  %s1953_s2 = inlined_call_operand.hbm [shape: f32[3,1,256], index: 2, kind: input, shape index: {}]   ;;  %s1954_s3 = inlined_call_operand.hbm [shape: f32[3,2,256], index: 3, kind: output, shape index: {}]  }
   0x1   :  { %1956 = sst [smem:[#allocation13_spill]] %s1951_s0 }
   0x2   :  { %1957 = sst [smem:[#allocation14_spill]] %s1952_s1 }
   0x3   :  { %8 = vsyncpa [#allocation3], 0 }
   0x4   :  { %9 = vsyncpa [#allocation6], 0 }
   0x5   :  { %11 = vsyncpa [#allocation6 + $0x1], 0 }
   0x6   :  { %12 = vsyncpa [#allocation4], 0 }
   0x7   :  { %14 = vsyncpa [#allocation4 + $0x1], 0  ;;  %s1686_s12 = smov 0   ;;  %s1688_s13 = smov 0  }
   0x8   :  { %s1690_s14 = smov 0   ;;  %s1692_s15 = smov 0  }
   0x9   :  { %s1694_s16 = smov 0   ;;  %s1696_s17 = smov 0  }
   0xa   :  { %s1698_s18 = smov 0   ;;  %s1700_s19 = smov 0  }
   0xb LB: > { %s29_s20 = sadd.s32 1, %s1652_s17  ;;  %s32_s21 = sadd.s32 1, %s1656_s18  ;;  %s1660_s19 = sphi %s1700_s19, %s20_s19   ;;  %s1656_s18 = sphi %s1698_s18, %s1974_s18   ;;  %s1652_s17 = sphi %s1696_s17, %s1973_s17   ;;  %s1648_s16 = sphi %s1694_s16, %s1972_s16   ;;  %s1644_s15 = sphi %s1692_s15, %s1971_s15   ;;  %s1640_s14 = sphi %s1690_s14, %s1970_s14   ;;  %s1636_s13 = sphi %s1688_s13, %s1969_s13   ;;  %s1632_s12 = sphi %s1686_s12, %s1968_s12  }
   0xc   : > { %p30_p0 = scmp.ge.s32.totalorder %s29_s20, 2  ;;  %s62_s22 = sadd.s32 1, %s1640_s14 }
   0xd   : > { %p69_p1 = scmp.ne.s32.totalorder %s1640_s14, %s1636_s13  ;;  %p70_p2 = scmp.eq.s32.totalorder %s1660_s19, 0 }
   0xe   : > { %s1976_s20 = smov (%p30_p0, %s29_s20), 0  ;;  %s1978_s21 = smov (!%p30_p0, %s32_s21), %s1656_s18 }
   0xf   : > { %s58_s23 = ssub.s32 %s1652_s17, %s1976_s20  ;;  %p1740_p3 = por %p70_p2, %p69_p1 }
  0x10   : > { %p34_p4 = scmp.ge.s32.totalorder %s1978_s21, 3  ;;  %p1396_p5 = scmp.lt.s32.totalorder %s1660_s19, 6 }
  0x11   : > { %s167_s25 = sand.u32 1, %s1660_s19   ;;  %s169_s26 = sand.u32 1, %s1640_s14  }
  0x12   : > { %s1980_s21 = smov (%p34_p4, %s1978_s21), 0  ;;  %s1037_s28 = sshll.u32 %s169_s26, 9 }
  0x13   : > { %1959 = sst [smem:[#allocation12_spill]] %s1980_s21  ;;  %s57_s27 = ssub.s32 %s1656_s18, %s1980_s21 }
  0x14   : > { %s59_s29 = sor.u32 %s58_s23, %s57_s27  ;;  %s1038_s30 = sshll.u32 %s1656_s18, 8 }
  0x15   : > { %p60_p6 = scmp.eq.s32.totalorder %s59_s29, 0  ;;  %s175_s4 = sadd.s32 %s1652_s17, %s1038_s30 }
  0x16   : > { %s171_s5 = scalar_lea.vmem [#allocation5], %s1037_s28  ;;  %s1039_s8 = sshll.u32 %s175_s4, 2 }
  0x17   : > { %s180_s6 = sshll.u32 %s171_s5, 4  ;;  %s1960_s1 = sld [smem:[#allocation14_spill]]  ;;  %s181_s6 = int_to_ptr.vmem [resolvable:$true] %s180_s6 }
  0x18   : > { %s1756_s7 = scalar_select %p60_p6, %s1640_s14, %s62_s22  }
  0x19   : > { %p1765_p7 = pnand %p1396_p5, %p1740_p3  ;;  %s1769_s22 = scalar_lea.sflag [#allocation6], %s167_s25 }
  0x1a   : > { %s1662_s28 = smov 128   ;;  %s1663_s29 = smov 64  }
  0x1b   : > { %s1664_s30 = smov 4   ;;  %s1775_s24 = sadd.s32 4294967295, %s1660_s19  }
  0x1c   : > { %s1033_s4 = sadd.s32 4294967294, %s1660_s19   ;;  %p75_p8 = scmp.ne.s32.totalorder %s1636_s13, %s1632_s12 }
  0x1d   : > { %s177_s11 = scalar_lea.hbm %s1960_s1, %s1039_s8  ;;  %p76_p9 = scmp.eq.s32.totalorder %s1775_s24, 0 }
  0x1e   : > { %s178_s27 = sshll.u32 %s177_s11, 4  ;;  %p129_p10 = scmp.eq.s32.totalorder %s1775_s24, 5  ;;  %s179_s27 = int_to_ptr.hbm [resolvable:$true] %s178_s27 }
  0x1f   : > { %1387 = dma.hbm_to_vmem [thread:$0]  (!%p1765_p7), %s179_s27, 8192, %s181_s6, %s1769_s22, %s1662_s28, %s1663_s29, %s1664_s30  }
  0x20   : > { %p135_p11 = scmp.eq.s32.totalorder %s1033_s4, 5  ;;  %p1784_p12 = por %p76_p9, %p75_p8 }
  0x21   : > { %p1034_p13 = scmp.ge.s32.totalorder %s1660_s19, 1  ;;  %p1792_p0 = por %p129_p10, %p69_p1 }
  0x22   : > { %p1796_p2 = por %p135_p11, %p75_p8  ;;  %p142_p3 = scmp.lt.s32.totalorder %s1660_s19, 7 }
  0x23   : > { %s1965_s0 = sld [smem:[#allocation13_spill]]  ;;  %s1665_s27 = smov [#allocation2]  }
  0x24   : > { %p1804_p4 = pnand %p1034_p13, %p142_p3  ;;  %s156_s28 = sshll.u32 %s1665_s27, 4  ;;  %s157_s28 = int_to_ptr.vmem [resolvable:$true] %s156_s28 }
  0x25   : > { %s1040_s29 = sshll.u32 %s1656_s18, 1  ;;  %s193_s30 = scalar_lea.vmem [#allocation7], %s169_s26 }
  0x26   : > { %p1380_p1 = pneg %p1804_p4  ;;  %s202_s4 = sshll.u32 %s193_s30, 4  ;;  %s203_s4 = int_to_ptr.vmem [resolvable:$true] %s202_s4 }
  0x27   : > { %s197_s8 = sadd.s32 %s1652_s17, %s1040_s29  ;;  %211 = sbr.rel (%p1804_p4) target bundleno = 256 (0x100), region = 32 }
  0x28   : > { %p1381_p5 = pnand %p1380_p1, %p76_p9  ;;  %s198_s1 = scalar_lea.hbm %s1953_s2, %s197_s8 }
  0x29   : > { %s154_s10 = sshll.u32 %s1965_s0, 4  ;;  %s200_s21 = sshll.u32 %s198_s1, 4  ;;  %s155_s10 = int_to_ptr.hbm [resolvable:$true] %s154_s10  ;;  %s201_s21 = int_to_ptr.hbm [resolvable:$true] %s200_s21 }
  0x2a   : > { %1383 = dma.hbm_to_vmem [thread:$0]  (!%p1381_p5), %s155_s10, 128, %s157_s28, [#allocation3]  }
  0x2b   : > { %1390 = dma.hbm_to_vmem [thread:$0]  (!%p1765_p7), %s201_s21, 16, %s203_s4, %s1769_s22  }
  0x2c   : > { %1619 = dma.done.wait (%p76_p9), [#allocation3], 128  }
  0x2d   : > { %1621 = vsyncadd (%p76_p9), [#allocation3], 4294967168  ;;  %s218_s0 = sand.u32 1, %s1775_s24   ;;  %s1830_s26 = sand.u32 1, %s1636_s13  }
  0x2e   : > { %s1043_s1 = sshll.u32 %s1830_s26, 9  ;;  %s219_s10 = scalar_lea.sflag [#allocation6], %s218_s0 }
  0x2f   : > { %s1833_s23 = scalar_lea.vmem [#allocation5], %s1043_s1 }
  0x30   : > { %1623 = dma.done.wait (%p1784_p12), %s219_s10, 8208  }
  0x31   : > { %1625 = vsyncadd (%p1784_p12), %s219_s10, 4294959088  ;;  %v1313_v0 = vld [vmem:[%s1833_s23 + $0x38] sm:$0xff]  ;;  %v1312_v4 = vld [vmem:[%s1833_s23 + $0x30] sm:$0xff]  ;;  %s231_s21 = scalar_lea.vmem [#allocation7], %s1830_s26  ;;  %s1302_s22 = sshll.u32 %s1648_s16, 1 }
  0x32   : > { %v1321_v1 = vld [vmem:[%s1833_s23 + $0x78] sm:$0xff]  ;;  %794 = vmatpush.bf16.msra.mxu0 %v1313_v0  ;;  %v1320_v5 = vld [vmem:[%s1833_s23 + $0x70] sm:$0xff]  ;;  %v1311_v8 = vld [vmem:[%s1833_s23 + $0x28] sm:$0xff]  ;;  %s910_s24 = sadd.s32 %s1644_s15, %s1302_s22  ;;  %s1044_s25 = sshll.u32 %s1830_s26, 1 }
  0x33   : > { %v1329_v2 = vld [vmem:[%s1833_s23 + $0xb8] sm:$0xff]  ;;  %807 = vmatpush.bf16.msra.mxu1 %v1321_v1  ;;  %v1328_v6 = vld [vmem:[%s1833_s23 + $0xb0] sm:$0xff]  ;;  %v1319_v9 = vld [vmem:[%s1833_s23 + $0x68] sm:$0xff]  ;;  %s1303_s11 = sshll.u32 %s910_s24, 1  ;;  %s258_s30 = scalar_lea.vmem [#allocation8], %s1044_s25 }
  0x34   : > { %v1337_v3 = vld [vmem:[%s1833_s23 + $0xf8] sm:$0xff]  ;;  %820 = vmatpush.bf16.msra.mxu2 %v1329_v2  ;;  %v1336_v7 = vld [vmem:[%s1833_s23 + $0xf0] sm:$0xff]  ;;  %v1327_v10 = vld [vmem:[%s1833_s23 + $0xa8] sm:$0xff]  ;;  %s912_s29 = scalar_lea.hbm %s1954_s3, %s1303_s11  ;;  %s914_s4 = sshll.u32 %s258_s30, 4  ;;  %s915_s4 = int_to_ptr.vmem [resolvable:$true] %s914_s4 }
  0x35   : > { %833 = vmatpush.bf16.msra.mxu3 %v1337_v3  ;;  %v1335_v11 = vld [vmem:[%s1833_s23 + $0xe8] sm:$0xff]  ;;  %v1310_v12 = vld [vmem:[%s1833_s23 + $0x20] sm:$0xff]  ;;  %v259_v16 = vld [vmem:[#allocation2] sm:$0xff]  ;;  %s916_s16 = sshll.u32 %s912_s29, 4  ;;  %s900_s15 = scalar_lea.sflag [#allocation4], %s1830_s26  ;;  %s917_s16 = int_to_ptr.hbm [resolvable:$true] %s916_s16 }
  0x36   : > { %795 = vmatpush.bf16.msra.mxu0 %v1312_v4  ;;  %v1318_v13 = vld [vmem:[%s1833_s23 + $0x60] sm:$0xff]  ;;  %v1309_v17 = vld [vmem:[%s1833_s23 + $0x18] sm:$0xff]  ;;  %393 = vst [vmem:[#allocation1] ss:$9 sm:$0xff] %v259_v16  ;;  %v1308_v21 = vld [vmem:[%s1833_s23 + $0x10] sm:$0xff]  ;;  %s1572_s8 = sshra.s32 %s917_s16, 4  ;;  %s1573_s8 = int_to_ptr.hbm [resolvable:$true] %s1572_s8 }
  0x37   : > { %808 = vmatpush.bf16.msra.mxu1 %v1320_v5  ;;  %v1326_v14 = vld [vmem:[%s1833_s23 + $0xa0] sm:$0xff]  ;;  %v1317_v18 = vld [vmem:[%s1833_s23 + $0x58] sm:$0xff]  ;;  %v1316_v22 = vld [vmem:[%s1833_s23 + $0x50] sm:$0xff]  ;;  %s1574_s9 = scalar_lea.hbm %s1573_s8, 2  ;;  %s1578_s10 = scalar_lea.hbm %s1954_s3, 12 }
  0x38   : > { %821 = vmatpush.bf16.msra.mxu2 %v1328_v6  ;;  %v1334_v15 = vld [vmem:[%s1833_s23 + $0xe0] sm:$0xff]  ;;  %v1325_v19 = vld [vmem:[%s1833_s23 + $0x98] sm:$0xff]  ;;  %v1324_v23 = vld [vmem:[%s1833_s23 + $0x90] sm:$0xff]  ;;  %p1575_p6 = scmp.ne.s32.totalorder %s1573_s8, %s1574_s9  ;;  %p1579_p9 = scmp.lt.s32.totalorder %s1573_s8, %s1954_s3 }
  0x39   : > { %834 = vmatpush.bf16.msra.mxu3 %v1336_v7  ;;  %v1333_v20 = vld [vmem:[%s1833_s23 + $0xd8] sm:$0xff]  ;;  %v1332_v24 = vld [vmem:[%s1833_s23 + $0xd0] sm:$0xff]  ;;  %v1307_v25 = vld [vmem:[%s1833_s23 + $0x8] sm:$0xff]  ;;  %p1580_p10 = scmp.lt.s32.totalorder %s1578_s10, %s1574_s9 }
  0x3a   : > { %796 = vmatpush.bf16.msra.mxu0 %v1311_v8  ;;  %v1315_v26 = vld [vmem:[%s1833_s23 + $0x48] sm:$0xff]  ;;  %v1306_v29 = vld [vmem:[%s1833_s23] sm:$0xff]  ;;  %v1345_v33 = vld [vmem:[%s1833_s23 + $0x138] sm:$0xff]  ;;  %p1576_p7 = pnand %p1575_p6, %p1792_p0 }
  0x3b   : > { %809 = vmatpush.bf16.msra.mxu1 %v1319_v9  ;;  %v1323_v27 = vld [vmem:[%s1833_s23 + $0x88] sm:$0xff]  ;;  %v1314_v30 = vld [vmem:[%s1833_s23 + $0x40] sm:$0xff]  ;;  %v1353_v34 = vld [vmem:[%s1833_s23 + $0x178] sm:$0xff]  ;;  %p1581_p11 = por %p1580_p10, %p1579_p9 }
  0x3c   : > { %822 = vmatpush.bf16.msra.mxu2 %v1327_v10  ;;  %v1331_v28 = vld [vmem:[%s1833_s23 + $0xc8] sm:$0xff]  ;;  %v1322_v31 = vld [vmem:[%s1833_s23 + $0x80] sm:$0xff]  ;;  %v1361_v35 = vld [vmem:[%s1833_s23 + $0x1b8] sm:$0xff]  ;;  %p1577_p8 = pneg %p1576_p7 }
  0x3d   : > { %835 = vmatpush.bf16.msra.mxu3 %v1335_v11  ;;  %v1330_v32 = vld [vmem:[%s1833_s23 + $0xc0] sm:$0xff]  ;;  %v1369_v36 = vld [vmem:[%s1833_s23 + $0x1f8] sm:$0xff]  ;;  %v1344_v37 = vld [vmem:[%s1833_s23 + $0x130] sm:$0xff] }
  0x3e   : > { %797 = vmatpush.bf16.msra.mxu0 %v1310_v12  ;;  %v396_v38 = vld [vmem:[#allocation1 + $0x12] sm:$0xff]  ;;  %v397_v39 = vld [vmem:[#allocation1 + $0x1b] sm:$0xff]  ;;  %v395_v42 = vld [vmem:[#allocation1 + $0x9] sm:$0xff]  ;;  %p1582_p12 = pnand %p1581_p11, %p1577_p8 }
  0x3f   : > { %810 = vmatpush.bf16.msra.mxu1 %v1318_v13  ;;  %v1352_v40 = vld [vmem:[%s1833_s23 + $0x170] sm:$0xff]  ;;  %v1343_v45 = vld [vmem:[%s1833_s23 + $0x128] sm:$0xff]  ;;  %v1342_v49 = vld [vmem:[%s1833_s23 + $0x120] sm:$0xff] }
  0x40   : > { %823 = vmatpush.bf16.msra.mxu2 %v1326_v14  ;;  %v394_v41 = vld [vmem:[#allocation1] sm:$0xff]  ;;  %v1351_v46 = vld [vmem:[%s1833_s23 + $0x168] sm:$0xff]  ;;  %v1350_v50 = vld [vmem:[%s1833_s23 + $0x160] sm:$0xff] }
  0x41   : > { %836 = vmatpush.bf16.msra.mxu3 %v1334_v15  ;;  %v1360_v43 = vld [vmem:[%s1833_s23 + $0x1b0] sm:$0xff]  ;;  %v1359_v47 = vld [vmem:[%s1833_s23 + $0x1a8] sm:$0xff]  ;;  %v1358_v51 = vld [vmem:[%s1833_s23 + $0x1a0] sm:$0xff] }
  0x42   : > { %798 = vmatpush.bf16.msra.mxu0 %v1309_v17  ;;  %v1368_v44 = vld [vmem:[%s1833_s23 + $0x1f0] sm:$0xff]  ;;  %v1367_v48 = vld [vmem:[%s1833_s23 + $0x1e8] sm:$0xff]  ;;  %v1366_v52 = vld [vmem:[%s1833_s23 + $0x1e0] sm:$0xff] }
  0x43   : > { %811 = vmatpush.bf16.msra.mxu1 %v1317_v18  ;;  %v1341_v53 = vld [vmem:[%s1833_s23 + $0x118] sm:$0xff]  ;;  %v1340_v57 = vld [vmem:[%s1833_s23 + $0x110] sm:$0xff]  ;;  %v1339_v61 = vld [vmem:[%s1833_s23 + $0x108] sm:$0xff] }
  0x44   : > { %824 = vmatpush.bf16.msra.mxu2 %v1325_v19  ;;  %v1349_v54 = vld [vmem:[%s1833_s23 + $0x158] sm:$0xff]  ;;  %v1348_v58 = vld [vmem:[%s1833_s23 + $0x150] sm:$0xff]  ;;  %v1347_v62 = vld [vmem:[%s1833_s23 + $0x148] sm:$0xff] }
  0x45   : > { %837 = vmatpush.bf16.msra.mxu3 %v1333_v20  ;;  %v1357_v55 = vld [vmem:[%s1833_s23 + $0x198] sm:$0xff]  ;;  %v1356_v59 = vld [vmem:[%s1833_s23 + $0x190] sm:$0xff]  ;;  %v1355_v63 = vld [vmem:[%s1833_s23 + $0x188] sm:$0xff] }
  0x46   : > { %799 = vmatpush.bf16.msra.mxu0 %v1308_v21  ;;  %v1365_v56 = vld [vmem:[%s1833_s23 + $0x1d8] sm:$0xff]  ;;  %v1364_v60 = vld [vmem:[%s1833_s23 + $0x1d0] sm:$0xff]  ;;  %v1363_v0 = vld [vmem:[%s1833_s23 + $0x1c8] sm:$0xff] }
  0x47   : > { %812 = vmatpush.bf16.msra.mxu1 %v1316_v22  ;;  %v1338_v1 = vld [vmem:[%s1833_s23 + $0x100] sm:$0xff]  ;;  %v398_v5 = vld [vmem:[#allocation1 + $0x24] sm:$0xff]  ;;  %v1467_v15 = vld [vmem:[%s231_s21] ss:$0 sm:$0xff] }
  0x48   : > { %825 = vmatpush.bf16.msra.mxu2 %v1324_v23  ;;  %v1346_v2 = vld [vmem:[%s1833_s23 + $0x140] sm:$0xff]  ;;  %v401_v8 = vld [vmem:[#allocation1 + $0x3f] sm:$0xff] }
  0x49   : > { %838 = vmatpush.bf16.msra.mxu3 %v1332_v24  ;;  %v1354_v3 = vld [vmem:[%s1833_s23 + $0x180] sm:$0xff] }
  0x4a   : > { %800 = vmatpush.bf16.msra.mxu0 %v1307_v25  ;;  %v1362_v4 = vld [vmem:[%s1833_s23 + $0x1c0] sm:$0xff] }
  0x4b   : > { %813 = vmatpush.bf16.msra.mxu1 %v1315_v26  ;;  %v399_v6 = vld [vmem:[#allocation1 + $0x2d] sm:$0xff]  ;;  %v400_v7 = vld [vmem:[#allocation1 + $0x36] sm:$0xff] }
  0x4c   : > { %826 = vmatpush.bf16.msra.mxu2 %v1323_v27 }
  0x4d   : > { %839 = vmatpush.bf16.msra.mxu3 %v1331_v28 }
  0x4e   : > { %801 = vmatpush.bf16.msra.mxu0 %v1306_v29 }
  0x4f   : > { %814 = vmatpush.bf16.msra.mxu1 %v1314_v30 }
  0x50   : > { %827 = vmatpush.bf16.msra.mxu2 %v1322_v31 }
  0x51   : > { %840 = vmatpush.bf16.msra.mxu3 %v1330_v32  ;;  %802 = vmatmul.bf16.vlgmr.msra.gmra.mxu0 %v394_v41 }
  0x52   : > { %846 = vmatpush.bf16.msrb.mxu0 %v1345_v33  ;;  %815 = vmatmul.bf16.vlgmr.msra.gmra.mxu1 %v395_v42 }
  0x53   : > { %859 = vmatpush.bf16.msrb.mxu1 %v1353_v34  ;;  %828 = vmatmul.bf16.vlgmr.msra.gmra.mxu2 %v396_v38 }
  0x54   : > { %872 = vmatpush.bf16.msrb.mxu2 %v1361_v35  ;;  %841 = vmatmul.bf16.vlgmr.msra.gmra.mxu3 %v397_v39 }
  0x55   : > { %885 = vmatpush.bf16.msrb.mxu3 %v1369_v36 }
  0x56   : > { %847 = vmatpush.bf16.msrb.mxu0 %v1344_v37 }
  0x57   : > { %860 = vmatpush.bf16.msrb.mxu1 %v1352_v40 }
  0x58   : > { %873 = vmatpush.bf16.msrb.mxu2 %v1360_v43 }
  0x59   : > { %886 = vmatpush.bf16.msrb.mxu3 %v1368_v44 }
  0x5a   : > { %848 = vmatpush.bf16.msrb.mxu0 %v1343_v45 }
  0x5b   : > { %861 = vmatpush.bf16.msrb.mxu1 %v1351_v46 }
  0x5c   : > { %874 = vmatpush.bf16.msrb.mxu2 %v1359_v47 }
  0x5d   : > { %887 = vmatpush.bf16.msrb.mxu3 %v1367_v48 }
  0x5e   : > { %849 = vmatpush.bf16.msrb.mxu0 %v1342_v49 }
  0x5f   : > { %862 = vmatpush.bf16.msrb.mxu1 %v1350_v50 }
  0x60   : > { %875 = vmatpush.bf16.msrb.mxu2 %v1358_v51 }
  0x61   : > { %888 = vmatpush.bf16.msrb.mxu3 %v1366_v52 }
  0x62   : > { %850 = vmatpush.bf16.msrb.mxu0 %v1341_v53 }
  0x63   : > { %863 = vmatpush.bf16.msrb.mxu1 %v1349_v54 }
  0x64   : > { %876 = vmatpush.bf16.msrb.mxu2 %v1357_v55 }
  0x65   : > { %889 = vmatpush.bf16.msrb.mxu3 %v1365_v56 }
  0x66   : > { %851 = vmatpush.bf16.msrb.mxu0 %v1340_v57 }
  0x67   : > { %864 = vmatpush.bf16.msrb.mxu1 %v1348_v58 }
  0x68   : > { %877 = vmatpush.bf16.msrb.mxu2 %v1356_v59 }
  0x69   : > { %890 = vmatpush.bf16.msrb.mxu3 %v1364_v60 }
  0x6a   : > { %852 = vmatpush.bf16.msrb.mxu0 %v1339_v61 }
  0x6b   : > { %865 = vmatpush.bf16.msrb.mxu1 %v1347_v62 }
  0x6c   : > { %878 = vmatpush.bf16.msrb.mxu2 %v1355_v63 }
  0x6d   : > { %891 = vmatpush.bf16.msrb.mxu3 %v1363_v0 }
  0x6e   : > { %853 = vmatpush.bf16.msrb.mxu0 %v1338_v1 }
  0x6f   : > { %866 = vmatpush.bf16.msrb.mxu1 %v1346_v2 }
  0x70   : > { %879 = vmatpush.bf16.msrb.mxu2 %v1354_v3 }
  0x71   : > { %892 = vmatpush.bf16.msrb.mxu3 %v1362_v4  ;;  %854 = vmatmul.bf16.vlgmr.msrb.gmra.mxu0 %v398_v5 }
  0x72   : > { %867 = vmatmul.bf16.vlgmr.msrb.gmra.mxu1 %v399_v6 }
  0x73   : > { %880 = vmatmul.bf16.vlgmr.msrb.gmra.mxu2 %v400_v7 }
  0x74   : > { %893 = vmatmul.bf16.vlgmr.msrb.gmra.mxu3 %v401_v8 }
  0xce   : > { %v803_v9 = vpop.f32.mrf.mxu0 }
  0xcf   : > { %v816_v10 = vpop.f32.mrf.mxu1  ;;  %v804_v18 = vadd.f32 %v1467_v15, %v803_v9 }
  0xd1   : > { %v817_v19 = vadd.f32 %v816_v10, %v804_v18 }
  0xd6   : > { %v829_v11 = vpop.f32.mrf.mxu2  ;;  %v805_v13 = vpop.f32.mrf.mxu0 }
  0xd7   : > { %v842_v12 = vpop.f32.mrf.mxu3  ;;  %v818_v14 = vpop.f32.mrf.mxu1  ;;  %v830_v20 = vadd.f32 %v829_v11, %v817_v19 }
  0xd9   : > { %v843_v21 = vadd.f32 %v842_v12, %v830_v20 }
  0xde   : > { %v831_v16 = vpop.f32.mrf.mxu2 }
  0xdf   : > { %v844_v17 = vpop.f32.mrf.mxu3 }
  0xee   : > { %v855_v22 = vpop.f32.mrf.mxu0 }
  0xef   : > { %v868_v23 = vpop.f32.mrf.mxu1  ;;  %v856_v24 = vadd.f32 %v855_v22, %v843_v21 }
  0xf1   : > { %v869_v25 = vadd.f32 %v868_v23, %v856_v24 }
  0xf6   : > { %v881_v26 = vpop.f32.mrf.mxu2  ;;  %v857_v29 = vpop.f32.mrf.mxu0 }
  0xf7   : > { %v894_v27 = vpop.f32.mrf.mxu3  ;;  %v882_v28 = vadd.f32 %v881_v26, %v869_v25  ;;  %v870_v30 = vpop.f32.mrf.mxu1 }
  0xf9   : > { %v895_v31 = vadd.f32 %v894_v27, %v882_v28 }
  0xfb   : > { %898 = vst [vmem:[%s258_s30] sm:$0x3] %v895_v31 }
  0xfc   : > { %1585 = shalt.err (!%p1582_p12)
}
  0xfd   : > { %1378 = dma.vmem_to_hbm [thread:$0]  (%p1792_p0), %s915_s4, 32, %s917_s16, %s900_s15  }
  0xfe   : > { %v883_v32 = vpop.f32.mrf.mxu2 }
  0xff   : > { %v896_v33 = vpop.f32.mrf.mxu3 }
 0x100 PF: > { %p1398_p13 = scmp.ge.s32.totalorder %s1660_s19, 2  ;;  %s928_s26 = sand.u32 1, %s1632_s12  }
 0x101   : > { %s929_s22 = scalar_lea.sflag [#allocation4], %s928_s26 }
 0x102   : > { %p1392_p3 = pnand %p1398_p13, %p1796_p2 }
 0x104   : > { %p1393_p4 = pneg %p1392_p3 }
 0x106   : > { %1627 = dma.done.wait (%p1393_p4), %s929_s22, 32  }
 0x107   : > { %1629 = vsyncadd (%p1393_p4), %s929_s22, 4294967264  ;;  %s20_s19 = sadd.s32 1, %s1660_s19   ;;  %s1967_s5 = sld [smem:[#allocation12_spill]] }
 0x108   : > { %p17_p1 = scmp.ge.s32.totalorder %s20_s19, 8   ;;  %s1968_s12 = smov %s1636_s13 }
 0x109   : > { %s1969_s13 = smov %s1640_s14  ;;  %s1970_s14 = smov %s1756_s7 }
 0x10a   : > { %s1971_s15 = smov %s1652_s17  ;;  %s1972_s16 = smov %s1656_s18 }
 0x10b   : > { %s1973_s17 = smov %s1976_s20  ;;  %19 = sbr.rel (!%p17_p1) target bundleno = 11 (0xb), region = 93 }
 0x10d   : > { %s1974_s18 = smov %s1967_s5 }
 0x110   :  { %935 = vsyncpa [#allocation3], 1 }
 0x111   :  { %937 = vsyncpa [#allocation3 + $0x1], 1 }
 0x112   :  { %938 = vsyncpa [#allocation6], 1 }
 0x113   :  { %940 = vsyncpa [#allocation6 + $0x1], 1 }
 0x114   :  { %941 = vsyncpa [#allocation4], 1 }
 0x115   :  { %943 = vsyncpa [#allocation4 + $0x1], 1 }

</bundles_post_ra>
